<compile_context>
chip_gen: v6e
topology: v6e:2x2x1
jax: 0.10.0
libtpu: 0.0.40
codegen_flags: <defaults>
</compile_context>

<pallas_src>
import jax
import jax.numpy as jnp
from jax import lax
from jax.experimental import pallas as pl
from jax.experimental.pallas import tpu as pltpu


def _make_kernel(scale: float, eps: float):
    def kernel(x_ref, gamma_ref, beta_ref, m_ref, n_ref, pb_ref, o_ref):
        x = x_ref[...]                                  # (TB, L, C)
        gamma = gamma_ref[...]                          # (1, C)
        beta = beta_ref[...]                            # (1, C)

        # --- LayerNorm over channels ---------------------------------------
        mean = jnp.mean(x, axis=-1, keepdims=True)
        cent = x - mean
        var = jnp.mean(cent * cent, axis=-1, keepdims=True)
        xn = cent * lax.rsqrt(var + eps) * gamma + beta  # (TB, L, C)  (also the residual)

        # --- adaptive_avg_pool2d(·, 1) == mean over tokens, per batch -------
        pool = jnp.mean(xn, axis=1)                      # (TB, C)

        # --- fused mat-vecs on the pooled token (no transposes) -------------
        #   u = pool @ (kwᵀ @ qw)   -> logits_{b,l} = <xn_{b,l}, u_b>
        #   w = pool @ (vwᵀ @ pwᵀ)  -> proj(attn @ v)_{b,l} = attn_{b,l} * w_b
        u = jnp.dot(pool, m_ref[...], preferred_element_type=jnp.float32)  # (TB, C)
        w = jnp.dot(pool, n_ref[...], preferred_element_type=jnp.float32)  # (TB, C)

        # --- attention logits: batched MXU matvec (flash einsum pattern) ----
        logits = jnp.einsum("blc,bkc->blk", xn, u[:, None, :],
                            preferred_element_type=jnp.float32)            # (TB, L, 1)
        attn = jax.nn.sigmoid(logits * scale)                              # (TB, L, 1)

        # --- (attn @ v) @ projᵀ + bias + residual, all collapsed -------------
        out = attn * w[:, None, :] + pb_ref[...] + xn                      # (TB, L, C)
        o_ref[...] = out.astype(o_ref.dtype)

    return kernel


def _pick_batch_block(B: int, L: int) -> int:
    """Batch elements per grid step.

    Target TB*L >= 256 rows per step (amortize per-step overhead, large DMA
    tiles) while keeping >= 2 grid steps when B > 1 so the parallel batch axis
    can be sharded across both v7x TensorCores.  TB must divide B.
    """
    tb = max(1, min(B, 256 // max(L, 1)))
    if B > 1:
        tb = min(tb, max(1, B // 2))
    while B % tb:
        tb -= 1
    return tb


def tamper_feat_predict_pallas(feat, params, *, num_heads=1, qk_scale=None,
                               eps=1e-5):
    """feat: (B, L, C) float32.  params: dict of weights (see init_params)."""
    B, L, C = feat.shape
    assert num_heads == 1, "kernel implements the module default num_heads=1"
    head_dim = C // num_heads
    scale = float(qk_scale) if qk_scale is not None else head_dim ** (-0.5)

    # One-off weight fusion (host/XLA side): removes two of the four (C,C)
    # matmuls from the kernel and every in-kernel weight transpose.
    m_fused = jnp.dot(params["k_w"].T, params["q_w"])        # (C, C) = kwᵀ @ qw
    n_fused = jnp.dot(params["v_w"].T, params["proj_w"].T)   # (C, C) = vwᵀ @ pwᵀ

    tb = _pick_batch_block(B, L)
    kernel = _make_kernel(scale, float(eps))

    full = lambda shape: pl.BlockSpec(shape, lambda b: (0,) * len(shape))

    return pl.pallas_call(
        kernel,
        out_shape=jax.ShapeDtypeStruct((B, L, C), feat.dtype),
        grid_spec=pltpu.PrefetchScalarGridSpec(
            num_scalar_prefetch=0,
            grid=(B // tb,),
            in_specs=[
                pl.BlockSpec((tb, L, C), lambda b: (b, 0, 0)),  # feat
                full((1, C)),                                   # ln gamma
                full((1, C)),                                   # ln beta
                full((C, C)),                                   # fused kᵀq
                full((C, C)),                                   # fused vᵀpᵀ
                full((1, C)),                                   # proj bias
            ],
            out_specs=pl.BlockSpec((tb, L, C), lambda b: (b, 0, 0)),
        ),
        compiler_params=pltpu.CompilerParams(
            dimension_semantics=("parallel",)),
    )(feat, params["ln_gamma"], params["ln_beta"], m_fused, n_fused,
      params["proj_b"])


def init_params(key, C):
    """Deterministic synthetic parameters matching the module's shapes."""
    ks = jax.random.split(key, 5)
    std = 0.02
    return {
        "ln_gamma": jnp.ones((1, C), jnp.float32),
        "ln_beta": jnp.zeros((1, C), jnp.float32),
        # nn.Linear weights are (out_features, in_features)
        "q_w": std * jax.random.normal(ks[0], (C, C), jnp.float32),
        "k_w": std * jax.random.normal(ks[1], (C, C), jnp.float32),
        "v_w": std * jax.random.normal(ks[2], (C, C), jnp.float32),
        "proj_w": std * jax.random.normal(ks[3], (C, C), jnp.float32),
        "proj_b": std * jax.random.normal(ks[4], (1, C), jnp.float32),
    }


def _reference(feat, params, eps=1e-5):
    """Pure-JAX re-implementation of the PyTorch forward (num_heads=1)."""
    B, L, C = feat.shape
    scale = C ** (-0.5)
    mean = jnp.mean(feat, axis=-1, keepdims=True)
    var = jnp.mean((feat - mean) ** 2, axis=-1, keepdims=True)
    xn = (feat - mean) / jnp.sqrt(var + eps) * params["ln_gamma"] + params["ln_beta"]
    shortcut = xn
    pool = jnp.mean(xn, axis=1, keepdims=True)                       # (B,1,C)
    q = xn @ params["q_w"].T                                         # (B,L,C)
    k = pool @ params["k_w"].T                                       # (B,1,C)
    v = pool @ params["v_w"].T                                       # (B,1,C)
    attn = jax.nn.sigmoid(jnp.einsum("blc,bkc->blk", q, k) * scale)  # (B,L,1)
    pred = attn @ v                                                  # (B,L,C)
    pred = pred @ params["proj_w"].T + params["proj_b"]
    return pred + shortcut


if __name__ == "__main__":
    B, L, C = 4, 16, 32   # L = 16 -> 4x4 spatial grid in the PyTorch reshape
    key = jax.random.PRNGKey(0)
    k_feat, k_par = jax.random.split(key)
    feat = jax.random.normal(k_feat, (B, L, C), jnp.float32)
    params = init_params(k_par, C)

    out = tamper_feat_predict_pallas(feat, params)
    out = jax.block_until_ready(out)

    ref = _reference(feat, params)
    assert out.shape == (B, L, C)
    assert jnp.allclose(out, ref, rtol=1e-4, atol=1e-4), \
        float(jnp.max(jnp.abs(out - ref)))

    print("KERNEL_OK")
</pallas_src>

<mosaic_0001>
module attributes {stable_mosaic.version = 11 : i64} {
  func.func @kernel(%arg0: i32, %arg1: memref<2x16x32xf32, #tpu.memory_space<vmem>>, %arg2: memref<1x32xf32, #tpu.memory_space<vmem>>, %arg3: memref<1x32xf32, #tpu.memory_space<vmem>>, %arg4: memref<32x32xf32, #tpu.memory_space<vmem>>, %arg5: memref<32x32xf32, #tpu.memory_space<vmem>>, %arg6: memref<1x32xf32, #tpu.memory_space<vmem>>, %arg7: memref<2x16x32xf32, #tpu.memory_space<vmem>>) attributes {dimension_semantics = [#tpu.dimension_semantics<parallel>], iteration_bounds = array<i64: 2>, scalar_prefetch = 0 : i64, scratch_operands = 0 : i64, tpu.core_type = #tpu.core_type<tc>, window_params = [{transform_indices = @transform_0, window_bounds = array<i64: 2, 16, 32>}, {pipeline_mode = #tpu.pipeline_mode<synchronous>, transform_indices = @transform_1, window_bounds = array<i64: 1, 32>}, {pipeline_mode = #tpu.pipeline_mode<synchronous>, transform_indices = @transform_2, window_bounds = array<i64: 1, 32>}, {pipeline_mode = #tpu.pipeline_mode<synchronous>, transform_indices = @transform_3, window_bounds = array<i64: 32, 32>}, {pipeline_mode = #tpu.pipeline_mode<synchronous>, transform_indices = @transform_4, window_bounds = array<i64: 32, 32>}, {pipeline_mode = #tpu.pipeline_mode<synchronous>, transform_indices = @transform_5, window_bounds = array<i64: 1, 32>}, {transform_indices = @transform_6, window_bounds = array<i64: 2, 16, 32>}]} {
    %c0 = arith.constant 0 : index
    %c0_0 = arith.constant 0 : index
    %c0_1 = arith.constant 0 : index
    %0 = vector.load %arg1[%c0, %c0_0, %c0_1] : memref<2x16x32xf32, #tpu.memory_space<vmem>>, vector<2x16x32xf32>
    %c0_2 = arith.constant 0 : index
    %c0_3 = arith.constant 0 : index
    %1 = vector.load %arg2[%c0_2, %c0_3] : memref<1x32xf32, #tpu.memory_space<vmem>>, vector<1x32xf32>
    %c0_4 = arith.constant 0 : index
    %c0_5 = arith.constant 0 : index
    %2 = vector.load %arg3[%c0_4, %c0_5] : memref<1x32xf32, #tpu.memory_space<vmem>>, vector<1x32xf32>
    %cst = arith.constant dense<0.000000e+00> : vector<2x16xf32>
    %3 = vector.multi_reduction <add>, %0, %cst [2] : vector<2x16x32xf32> to vector<2x16xf32>
    %4 = vector.shape_cast %3 : vector<2x16xf32> to vector<2x16x1xf32>
    %cst_6 = arith.constant 3.200000e+01 : f32
    %5 = vector.broadcast %cst_6 : f32 to vector<2x16x1xf32>
    %6 = arith.divf %4, %5 : vector<2x16x1xf32>
    %7 = vector.broadcast %6 : vector<2x16x1xf32> to vector<2x16x32xf32>
    %8 = arith.subf %0, %7 : vector<2x16x32xf32>
    %9 = arith.mulf %8, %8 : vector<2x16x32xf32>
    %cst_7 = arith.constant dense<0.000000e+00> : vector<2x16xf32>
    %10 = vector.multi_reduction <add>, %9, %cst_7 [2] : vector<2x16x32xf32> to vector<2x16xf32>
    %11 = vector.shape_cast %10 : vector<2x16xf32> to vector<2x16x1xf32>
    %cst_8 = arith.constant 3.200000e+01 : f32
    %12 = vector.broadcast %cst_8 : f32 to vector<2x16x1xf32>
    %13 = arith.divf %11, %12 : vector<2x16x1xf32>
    %cst_9 = arith.constant 9.99999974E-6 : f32
    %14 = vector.broadcast %cst_9 : f32 to vector<2x16x1xf32>
    %15 = arith.addf %13, %14 : vector<2x16x1xf32>
    %16 = math.rsqrt %15 : vector<2x16x1xf32>
    %17 = vector.broadcast %16 : vector<2x16x1xf32> to vector<2x16x32xf32>
    %18 = arith.mulf %8, %17 : vector<2x16x32xf32>
    %19 = vector.shape_cast %1 : vector<1x32xf32> to vector<1x1x32xf32>
    %20 = vector.broadcast %19 : vector<1x1x32xf32> to vector<2x16x32xf32>
    %21 = arith.mulf %18, %20 : vector<2x16x32xf32>
    %22 = vector.shape_cast %2 : vector<1x32xf32> to vector<1x1x32xf32>
    %23 = vector.broadcast %22 : vector<1x1x32xf32> to vector<2x16x32xf32>
    %24 = arith.addf %21, %23 : vector<2x16x32xf32>
    %cst_10 = arith.constant dense<0.000000e+00> : vector<2x32xf32>
    %25 = vector.multi_reduction <add>, %24, %cst_10 [1] : vector<2x16x32xf32> to vector<2x32xf32>
    %cst_11 = arith.constant 1.600000e+01 : f32
    %26 = vector.broadcast %cst_11 : f32 to vector<2x32xf32>
    %27 = arith.divf %25, %26 : vector<2x32xf32>
    %c0_12 = arith.constant 0 : index
    %c0_13 = arith.constant 0 : index
    %28 = vector.load %arg4[%c0_12, %c0_13] : memref<32x32xf32, #tpu.memory_space<vmem>>, vector<32x32xf32>
    %cst_14 = arith.constant dense<0.000000e+00> : vector<2x32xf32>
    %29 = tpu.matmul %27, %28, %cst_14 {dimension_numbers = #tpu.dot_dimension_numbers<[1], [0], [0], [1], [0, 0, 1, 1], [], []>} : vector<2x32xf32>, vector<32x32xf32>, vector<2x32xf32> -> vector<2x32xf32>
    %c0_15 = arith.constant 0 : index
    %c0_16 = arith.constant 0 : index
    %30 = vector.load %arg5[%c0_15, %c0_16] : memref<32x32xf32, #tpu.memory_space<vmem>>, vector<32x32xf32>
    %cst_17 = arith.constant dense<0.000000e+00> : vector<2x32xf32>
    %31 = tpu.matmul %27, %30, %cst_17 {dimension_numbers = #tpu.dot_dimension_numbers<[1], [0], [0], [1], [0, 0, 1, 1], [], []>} : vector<2x32xf32>, vector<32x32xf32>, vector<2x32xf32> -> vector<2x32xf32>
    %32 = vector.shape_cast %29 : vector<2x32xf32> to vector<2x1x32xf32>
    "tpu.trace_start"() <{level = 10 : i32, message = "blc,bkc->blk"}> : () -> ()
    %cst_18 = arith.constant dense<0.000000e+00> : vector<2x16x1xf32>
    %33 = tpu.matmul %24, %32, %cst_18 {dimension_numbers = #tpu.dot_dimension_numbers<[2], [2], [1], [1], [0, 0, 0, 1, 1, 1], [0], [0]>} : vector<2x16x32xf32>, vector<2x1x32xf32>, vector<2x16x1xf32> -> vector<2x16x1xf32>
    "tpu.trace_stop"() : () -> ()
    %cst_19 = arith.constant 0.176776692 : f32
    %34 = vector.broadcast %cst_19 : f32 to vector<2x16x1xf32>
    %35 = arith.mulf %33, %34 : vector<2x16x1xf32>
    %36 = arith.negf %35 : vector<2x16x1xf32>
    %37 = math.exp %36 : vector<2x16x1xf32>
    %cst_20 = arith.constant 1.000000e+00 : f32
    %38 = vector.broadcast %cst_20 : f32 to vector<2x16x1xf32>
    %39 = arith.addf %38, %37 : vector<2x16x1xf32>
    %40 = arith.divf %38, %39 : vector<2x16x1xf32>
    %41 = vector.shape_cast %31 : vector<2x32xf32> to vector<2x1x32xf32>
    %42 = vector.broadcast %40 : vector<2x16x1xf32> to vector<2x16x32xf32>
    %43 = vector.broadcast %41 : vector<2x1x32xf32> to vector<2x16x32xf32>
    %44 = arith.mulf %42, %43 : vector<2x16x32xf32>
    %c0_21 = arith.constant 0 : index
    %c0_22 = arith.constant 0 : index
    %45 = vector.load %arg6[%c0_21, %c0_22] : memref<1x32xf32, #tpu.memory_space<vmem>>, vector<1x32xf32>
    %46 = vector.shape_cast %45 : vector<1x32xf32> to vector<1x1x32xf32>
    %47 = vector.broadcast %46 : vector<1x1x32xf32> to vector<2x16x32xf32>
    %48 = arith.addf %44, %47 : vector<2x16x32xf32>
    %49 = arith.addf %48, %24 : vector<2x16x32xf32>
    %c0_23 = arith.constant 0 : index
    %c0_24 = arith.constant 0 : index
    %c0_25 = arith.constant 0 : index
    %50 = vector.load %arg7[%c0_23, %c0_24, %c0_25] : memref<2x16x32xf32, #tpu.memory_space<vmem>>, vector<2x16x32xf32>
    tpu.vector_store %arg7[%c0_23, %c0_24, %c0_25], %49 {strides = array<i32>} : memref<2x16x32xf32, #tpu.memory_space<vmem>>, vector<2x16x32xf32>,
    return
  }
  func.func @transform_0(%arg0: i32) -> (i32, i32, i32) {
    %c0_i32 = arith.constant 0 : i32
    %c0_i32_0 = arith.constant 0 : i32
    %c0_i32_1 = arith.constant 0 : i32
    return %arg0, %c0_i32, %c0_i32_0 : i32, i32, i32
  }
  func.func @transform_1(%arg0: i32) -> (i32, i32) {
    %c0_i32 = arith.constant 0 : i32
    %c0_i32_0 = arith.constant 0 : i32
    %c0_i32_1 = arith.constant 0 : i32
    return %c0_i32, %c0_i32_0 : i32, i32
  }
  func.func @transform_2(%arg0: i32) -> (i32, i32) {
    %c0_i32 = arith.constant 0 : i32
    %c0_i32_0 = arith.constant 0 : i32
    %c0_i32_1 = arith.constant 0 : i32
    return %c0_i32, %c0_i32_0 : i32, i32
  }
  func.func @transform_3(%arg0: i32) -> (i32, i32) {
    %c0_i32 = arith.constant 0 : i32
    %c0_i32_0 = arith.constant 0 : i32
    %c0_i32_1 = arith.constant 0 : i32
    return %c0_i32, %c0_i32_0 : i32, i32
  }
  func.func @transform_4(%arg0: i32) -> (i32, i32) {
    %c0_i32 = arith.constant 0 : i32
    %c0_i32_0 = arith.constant 0 : i32
    %c0_i32_1 = arith.constant 0 : i32
    return %c0_i32, %c0_i32_0 : i32, i32
  }
  func.func @transform_5(%arg0: i32) -> (i32, i32) {
    %c0_i32 = arith.constant 0 : i32
    %c0_i32_0 = arith.constant 0 : i32
    %c0_i32_1 = arith.constant 0 : i32
    return %c0_i32, %c0_i32_0 : i32, i32
  }
  func.func @transform_6(%arg0: i32) -> (i32, i32, i32) {
    %c0_i32 = arith.constant 0 : i32
    %c0_i32_0 = arith.constant 0 : i32
    %c0_i32_1 = arith.constant 0 : i32
    return %arg0, %c0_i32, %c0_i32_0 : i32, i32, i32
  }
}

</mosaic_0001>

<bundles_post_ra>
// kernel: tpu_custom_call.1
= control target key start
LH: loop header
LB: loop body
LE: loop exit
PB: predicated region body
PF: predicated region fallthrough
CT: control target
= control target key end

     0   :  { %11 = vsyncpa [#allocation3], 0  ;;  %s1456_s0 = inlined_call_operand.hbm [shape: f32[4,16,32], index: 0, kind: input, shape index: {}]   ;;  %s1457_s1 = inlined_call_operand.vmem [shape: f32[1,32], index: 1, kind: input, shape index: {}]   ;;  %s1458_s2 = inlined_call_operand.vmem [shape: f32[1,32], index: 2, kind: input, shape index: {}]   ;;  %s1459_s3 = inlined_call_operand.hbm [shape: f32[32,32], index: 3, kind: input, shape index: {}]   ;;  %s1460_s4 = inlined_call_operand.hbm [shape: f32[32,32], index: 4, kind: input, shape index: {}]   ;;  %s1461_s5 = inlined_call_operand.vmem [shape: f32[1,32], index: 5, kind: input, shape index: {}]   ;;  %s1462_s6 = inlined_call_operand.hbm [shape: f32[4,16,32], index: 6, kind: output, shape index: {}]  }
   0x1   :  { %13 = vsyncpa [#allocation3 + $0x1], 0 }
   0x2   :  { %14 = vsyncpa [#allocation6], 0 }
   0x3   :  { %15 = vsyncpa [#allocation4], 0 }
   0x4   :  { %17 = vsyncpa [#allocation4 + $0x1], 0  ;;  %s1180_s21 = smov 0   ;;  %s1182_s22 = smov 0  }
   0x5   :  { %s1184_s23 = smov 0   ;;  %s1186_s24 = smov 0  }
   0x6 LB: > { %s1201_s25 = sadd.s32 4294967295, %s1131_s24   ;;  %s817_s26 = sadd.s32 4294967294, %s1131_s24   ;;  %s1131_s24 = sphi %s1186_s24, %s1487_s24   ;;  %s1127_s23 = sphi %s1184_s23, %s1486_s23   ;;  %s1123_s22 = sphi %s1182_s22, %s1485_s22   ;;  %s1119_s21 = sphi %s1180_s21, %s1484_s21  }
   0x7   : > { %p43_p0 = scmp.ne.s32.totalorder %s1123_s22, %s1119_s21  ;;  %p1463_p1 = scmp.eq.s32.totalorder %s1201_s25, 0 }
   0x8   : > { %p172_p2 = scmp.eq.s32.totalorder %s1201_s25, 1  ;;  %p178_p3 = scmp.eq.s32.totalorder %s817_s26, 1 }
   0x9   : > { %p1210_p4 = por %p1463_p1, %p43_p0  ;;  %p818_p5 = scmp.ge.s32.totalorder %s1131_s24, 1 }
   0xa   : > { %p1215_p6 = por %p178_p3, %p43_p0  ;;  %p185_p7 = scmp.lt.s32.totalorder %s1131_s24, 3 }
   0xb   : > { %s1469_s27 = scalar_select %p1210_p4, 1, 0 }
   0xc   : > { %s1470_s28 = scalar_select %p1215_p6, 1, 0 }
   0xd   : > { %p1220_p8 = pnand %p818_p5, %p185_p7  ;;  %s1133_s30 = smov [#allocation5]  }
   0xe   : > { %s203_s7 = sshll.u32 %s1133_s30, 4  ;;  %s1134_s9 = smov [#allocation7]   ;;  %s204_s7 = int_to_ptr.vmem [resolvable:$true] %s203_s7 }
   0xf   : > { %s1471_s29 = scalar_select %p1220_p8, 1, 0 }
  0x10   : > { %p894_p9 = pneg %p1220_p8  ;;  %s216_s10 = sshll.u32 %s1134_s9, 4  ;;  %s217_s10 = int_to_ptr.vmem [resolvable:$true] %s216_s10 }
  0x11   : > { %s994_s11 = scalar_lea.vmem %s204_s7, 512  ;;  %p1002_p5 = scmp.lt.s32.totalorder %s204_s7, %s204_s7 }
  0x12   : > { %p1229_p11 = pnand %p894_p9, %p1463_p1  ;;  %p995_p13 = scmp.ne.s32.totalorder %s204_s7, %s994_s11 }
  0x13   : > { %p1003_p7 = scmp.lt.s32.totalorder %s994_s11, %s994_s11 }
  0x14   : > { %p985_p12 = pneg %p1229_p11 }
  0x15   : > { %p1004_p10 = por %p1003_p7, %p1002_p5 }
  0x16   : > { %p997_p0 = pnand %p995_p13, %p985_p12 }
  0x18   : > { %p998_p3 = pneg %p997_p0 }
  0x1a   : > { %p1005_p9 = pnand %p1004_p10, %p998_p3 }
  0x1c   : > { %1008 = shalt.err (!%p1005_p9)
}
  0x1d   : > { %s1464_s12 = smov 128   ;;  %s1465_s13 = smov 8  }
  0x1e   : > { %897 = dma.hbm_to_vmem [thread:$0]  (!%p1229_p11), %s1459_s3, 512, %s204_s7, [#allocation6], %s1464_s12, %s1464_s12, %s1465_s13  }
  0x1f   : > { %s1020_s16 = scalar_lea.vmem %s217_s10, 512  ;;  %p1028_p10 = scmp.lt.s32.totalorder %s217_s10, %s217_s10 }
  0x20   : > { %p1021_p13 = scmp.ne.s32.totalorder %s217_s10, %s1020_s16  ;;  %p1029_p3 = scmp.lt.s32.totalorder %s1020_s16, %s1020_s16 }
  0x22   : > { %p1023_p0 = pnand %p1021_p13, %p985_p12  ;;  %p1030_p7 = por %p1029_p3, %p1028_p10 }
  0x24   : > { %p1024_p5 = pneg %p1023_p0 }
  0x26   : > { %p1031_p9 = pnand %p1030_p7, %p1024_p5 }
  0x28   : > { %1034 = shalt.err (!%p1031_p9)
}
  0x29   : > { %900 = dma.hbm_to_vmem [thread:$0]  (!%p1229_p11), %s1460_s4, 512, %s217_s10, [#allocation6], %s1464_s12, %s1464_s12, %s1465_s13  }
  0x2a   : > { %s1258_s19 = sadd.s32 1, %s1131_s24   ;;  %s30_s20 = sadd.s32 1, %s1127_s23 }
  0x2b   : > { %s27_s26 = ssub.s32 %s1131_s24, %s1258_s19  ;;  %p37_p12 = scmp.ne.s32.totalorder %s1127_s23, %s1123_s22 }
  0x2c   : > { %p28_p13 = scmp.eq.s32.totalorder %s27_s26, 0  ;;  %p38_p0 = scmp.eq.s32.totalorder %s1131_s24, 0 }
  0x2d   : > { %p1268_p5 = por %p172_p2, %p37_p12  ;;  %p911_p10 = scmp.lt.s32.totalorder %s1131_s24, 2 }
  0x2e   : > { %s1274_s7 = scalar_select %p28_p13, %s1127_s23, %s30_s20  }
  0x2f   : > { %s1473_s30 = scalar_select %p1268_p5, 1, 0 }
  0x30   : > { %p39_p3 = por %p38_p0, %p37_p12  ;;  %s233_s8 = sand.u32 1, %s1127_s23  }
  0x31   : > { %s822_s9 = sshll.u32 %s233_s8, 5  ;;  %s847_s10 = sshll.u32 %s1131_s24, 9 }
  0x32   : > { %s1281_s15 = scalar_lea.hbm %s1456_s0, %s847_s10  ;;  %s237_s16 = scalar_lea.vmem [#allocation2], %s822_s9 }
  0x33   : > { %s245_s17 = sshll.u32 %s237_s16, 4  ;;  %p1285_p2 = pnand %p911_p10, %p39_p3  ;;  %s1283_s17 = int_to_ptr.vmem [resolvable:$true] %s245_s17 }
  0x34   : > { %s1289_s20 = scalar_lea.sflag [#allocation3], %s233_s8  ;;  %s1035_s26 = scalar_lea.hbm %s1281_s15, 512 }
  0x35   : > { %p1036_p11 = scmp.ne.s32.totalorder %s1281_s15, %s1035_s26  ;;  %p1037_p7 = pneg %p1285_p2 }
  0x36   : > { %s1040_s9 = scalar_lea.hbm %s1456_s0, 1024  ;;  %p1041_p13 = scmp.lt.s32.totalorder %s1281_s15, %s1456_s0 }
  0x37   : > { %p1038_p9 = pnand %p1037_p7, %p1036_p11  ;;  %p1042_p0 = scmp.lt.s32.totalorder %s1040_s9, %s1035_s26 }
  0x39   : > { %p1039_p12 = pneg %p1038_p9  ;;  %p1043_p10 = por %p1042_p0, %p1041_p13 }
  0x3b   : > { %p1044_p3 = pnand %p1043_p10, %p1039_p12 }
  0x3d   : > { %1047 = shalt.err (!%p1044_p3)
}
  0x3e   : > { %s1048_s8 = scalar_lea.vmem %s1283_s17, 512  ;;  %s1137_s12 = smov [#allocation2]  }
  0x3f   : > { %p1049_p1 = scmp.ne.s32.totalorder %s1283_s17, %s1048_s8  ;;  %s1053_s13 = sshll.u32 %s1137_s12, 4  ;;  %s1054_s13 = int_to_ptr.vmem [resolvable:$false] %s1053_s13 }
  0x40   : > { %s1055_s10 = scalar_lea.vmem %s1054_s13, 1024  ;;  %p1056_p9 = scmp.lt.s32.totalorder %s1283_s17, %s1054_s13 }
  0x41   : > { %p1051_p6 = pnand %p1049_p1, %p1037_p7  ;;  %p1057_p5 = scmp.lt.s32.totalorder %s1055_s10, %s1048_s8 }
  0x43   : > { %p1052_p11 = pneg %p1051_p6  ;;  %p1058_p4 = por %p1057_p5, %p1056_p9 }
  0x45   : > { %p1059_p8 = pnand %p1058_p4, %p1052_p11 }
  0x47   : > { %1062 = shalt.err (!%p1059_p8)
}
  0x48   : > { %s1475_s26 = smov 8   ;;  %s1476_s11 = smov 128  }
  0x49   : > { %904 = dma.hbm_to_vmem [thread:$0]  (!%p1285_p2), %s1281_s15, 512, %s1283_s17, %s1289_s20, %s1476_s11, %s1476_s11, %s1475_s26  }
  0x4a   : > { %p1477_p1 = scmp.ne.s32.totalorder %s1471_s29, 0 }
  0x4b   : > { %s1316_s12 = sand.u32 (!%p1477_p1), 1, %s1123_s22   ;;  %p1478_p4 = scmp.ne.s32.totalorder (!%p1477_p1), %s1469_s27, 0 }
  0x4c   : > { %257 = sbr.rel (%p1477_p1) target bundleno = 947 (0x3b3), region = 44  ;;  %s827_s13 = sshll.u32 (!%p1477_p1), %s1316_s12, 5 }
  0x4d   : > { %s260_s9 = scalar_lea.sflag (!%p1477_p1), [#allocation3], %s1316_s12  ;;  %s263_s18 = scalar_lea.vmem (!%p1477_p1), [#allocation2], %s827_s13 }
  0x51   : > { %1106 = dma.done.wait (%p1478_p4), %s260_s9, 512  }
  0x52   : > { %1108 = vsyncadd (%p1478_p4), %s260_s9, 4294966784  ;;  %p1479_p6 = scmp.eq.s32.totalorder %s1201_s25, 0 }
  0x54   : > { %1110 = dma.done.wait (%p1479_p6), [#allocation6], 1024   ;;  %p1480_p8 = pmov %p1479_p6 }
  0x55   : > { %vm308_vm0 = vcmask 261120   ;;  %v302_v0 = vld [vmem:[%s263_s18] sm:$0xff]  ;;  %v304_v1 = vld [vmem:[%s263_s18 + $0x10] sm:$0xff]  ;;  %v303_v2 = vld [vmem:[%s263_s18 + $0x8] sm:$0xff]  ;;  %v1138_v30 = vmov 0.0   ;;  %vm1139_vm1 = vmmov 0  }
  0x56   : > { %1112 = vsyncadd (%p1480_p8), [#allocation6], 4294966272  ;;  %v309_v3 = vsel %vm308_vm0, %v302_v0, 0.0  ;;  %v315_v4 = vsel %vm308_vm0, %v304_v1, 0.0  ;;  %v305_v5 = vld [vmem:[%s263_s18 + $0x18] sm:$0xff]  ;;  %v312_v6 = vsel %vm308_vm0, %v303_v2, 0.0  ;;  %860 = vmatprep.subr.mxu0 %v1138_v30  ;;  %871 = vmatprep.subr.mxu1 %v1138_v30 }
  0x57   : > { %310 = vadd.xlane.f32.xlu0 %v309_v3  ;;  %316 = vadd.xlane.f32.xlu1 %v315_v4  ;;  %v318_v7 = vsel %vm308_vm0, %v305_v5, 0.0  ;;  %v406_v28 = vld [vmem:[#allocation5 + $0x18] sm:$0xff]  ;;  %v405_v31 = vld [vmem:[#allocation5 + $0x10] sm:$0xff]  ;;  %v404_v33 = vld [vmem:[#allocation5 + $0x8] sm:$0xff]  ;;  %vm409_vm2 = vcmask 1041409   ;;  %s299_s16 = scalar_lea.vmem [#allocation8], %s827_s13 }
  0x58   : > { %v486_v29 = vld [vmem:[#allocation7 + $0x18] sm:$0xff]  ;;  %v485_v32 = vld [vmem:[#allocation7 + $0x10] sm:$0xff]  ;;  %861 = vmatpush3.msra.mxu0 %v406_v28  ;;  %v484_v34 = vld [vmem:[#allocation7 + $0x8] sm:$0xff]  ;;  %868 = vmatprep.mubr.msk.f32.mxu0 %vm1139_vm1, %v1138_v30  ;;  %s849_s8 = sshll.u32 %s1201_s25, 9  ;;  %s725_s10 = sshll.u32 %s299_s16, 4  ;;  %s1411_s10 = int_to_ptr.vmem [resolvable:$true] %s725_s10 }
  0x59   : > { %872 = vmatpush3.msra.mxu1 %v486_v29  ;;  %862 = vmatprep.subr.mxu0 %v1138_v30  ;;  %v403_v35 = vld [vmem:[#allocation5] sm:$0xff]  ;;  %s1409_s13 = scalar_lea.hbm %s1462_s6, %s849_s8  ;;  %s711_s9 = scalar_lea.sflag [#allocation4], %s1316_s12 }
  0x5a   : > { %873 = vmatprep.subr.mxu1 %v1138_v30  ;;  %863 = vmatpush3.msra.mxu0 %v405_v31  ;;  %v483_v36 = vld [vmem:[#allocation7] sm:$0xff]  ;;  %s1063_s25 = scalar_lea.vmem %s1411_s10, 512  ;;  %p1481_p2 = scmp.ne.s32.totalorder %s1473_s30, 0 }
  0x5b   : > { %313 = vadd.xlane.f32.xlu0 %v312_v6  ;;  %319 = vadd.xlane.f32.xlu1 %v318_v7  ;;  %v831_v50 = vld [vmem:[%s1457_s1] ss:$0 sm:$0xff]  ;;  %p1064_p5 = scmp.ne.s32.totalorder %s1411_s10, %s1063_s25  ;;  %s1142_s18 = smov [#allocation8]  }
  0x5c   : > { %874 = vmatpush3.msra.mxu1 %v485_v32  ;;  %864 = vmatprep.subr.mxu0 %v1138_v30  ;;  %v832_v54 = vld [vmem:[%s1458_s2] ss:$0 sm:$0xff]  ;;  %s1067_s27 = sshll.u32 %s1142_s18, 4  ;;  %s1068_s27 = int_to_ptr.vmem [resolvable:$false] %s1067_s27 }
  0x5d   : > { %875 = vmatprep.subr.mxu1 %v1138_v30  ;;  %865 = vmatpush3.msra.mxu0 %v404_v33  ;;  %p1065_p7 = pnand %p1064_p5, %p1481_p2  ;;  %s1069_s29 = scalar_lea.vmem %s1068_s27, 1024 }
  0x5e   : > { %876 = vmatpush3.msra.mxu1 %v484_v34  ;;  %866 = vmatprep.subr.mxu0 %v1138_v30  ;;  %p1070_p13 = scmp.lt.s32.totalorder %s1411_s10, %s1068_s27  ;;  %p1071_p0 = scmp.lt.s32.totalorder %s1069_s29, %s1063_s25 }
  0x5f   : > { %877 = vmatprep.subr.mxu1 %v1138_v30  ;;  %867 = vmatpush3.msra.mxu0 %v403_v35  ;;  %p1066_p12 = pneg %p1065_p7 }
  0x60   : > { %878 = vmatpush3.msra.mxu1 %v483_v36  ;;  %879 = vmatprep.mubr.msk.f32.mxu1 %vm1139_vm1, %v1138_v30  ;;  %p1072_p10 = por %p1071_p0, %p1070_p13 }
  0x62   : > { %p1073_p3 = pnand %p1072_p10, %p1066_p12 }
  0xe0   : > { %v311_v8 = vpop.xlane.xlu0 %310  ;;  %v317_v9 = vpop.xlane.xlu1 %316 }
  0xe1   : > { %v322_v10 = vmul.f32 0.03125, %v311_v8  ;;  %v324_v11 = vmul.f32 0.03125, %v317_v9 }
  0xe3   : > { %v1334_v12 = vsub.f32 %v302_v0, %v322_v10  ;;  %v1336_v13 = vsub.f32 %v304_v1, %v324_v11 }
  0xe4   : > { %v314_v14 = vpop.xlane.xlu0 %313  ;;  %v320_v15 = vpop.xlane.xlu1 %319 }
  0xe5   : > { %v323_v16 = vmul.f32 0.03125, %v314_v14  ;;  %v325_v17 = vmul.f32 0.03125, %v320_v15  ;;  %v330_v18 = vmul.f32 %v1334_v12, %v1334_v12  ;;  %v332_v19 = vmul.f32 %v1336_v13, %v1336_v13 }
  0xe7   : > { %v1342_v20 = vsub.f32 %v303_v2, %v323_v16  ;;  %v1344_v21 = vsub.f32 %v305_v5, %v325_v17  ;;  %v334_v22 = vsel %vm308_vm0, %v330_v18, 0.0  ;;  %v340_v23 = vsel %vm308_vm0, %v332_v19, 0.0 }
  0xe8   : > { %335 = vadd.xlane.f32.xlu0 %v334_v22 }
  0xe9   : > { %v331_v24 = vmul.f32 %v1342_v20, %v1342_v20  ;;  %v333_v25 = vmul.f32 %v1344_v21, %v1344_v21 }
  0xeb   : > { %v337_v26 = vsel %vm308_vm0, %v331_v24, 0.0  ;;  %v343_v27 = vsel %vm308_vm0, %v333_v25, 0.0  ;;  %v1140_v24 = vmov 1966171168  }
  0xec   : > { %341 = vadd.xlane.f32.xlu0 %v340_v23  ;;  %338 = vadd.xlane.f32.xlu1 %v337_v26  ;;  %v559_v25 = vunpack.c.l.s4 %v1140_v24  ;;  %v561_v26 = vlaneseq }
  0xee   : > { %v562_v28 = vshrl.u32 %v561_v26, 7 }
  0xf0   : > { %344 = vadd.xlane.f32.xlu1 %v343_v27  ;;  %v560_v27 = vunpack.c.0.s8 %v559_v25  ;;  %v582_v34 = vsub.s32 0, %v562_v28 }
  0xf2   : > { %v563_v29 = vsub.s32 %v560_v27, %v562_v28 }
 0x171   : > { %v336_v37 = vpop.xlane.xlu0 %335 }
 0x172   : > { %v346_v38 = vmul.f32 0.03125, %v336_v37 }
 0x174   : > { %v350_v39 = vadd.f32 1e-05, %v346_v38 }
 0x175   : > { %v339_v40 = vpop.xlane.xlu1 %338  ;;  %v342_v41 = vpop.xlane.xlu0 %341 }
 0x176   : > { %959 = vrsqrt.f32 %v350_v39  ;;  %v347_v42 = vmul.f32 0.03125, %v339_v40  ;;  %v348_v43 = vmul.f32 0.03125, %v342_v41 }
 0x178   : > { %v351_v44 = vadd.f32 1e-05, %v347_v42  ;;  %v352_v45 = vadd.f32 1e-05, %v348_v43 }
 0x179   : > { %v345_v46 = vpop.xlane.xlu1 %344 }
 0x17a   : > { %961 = vrsqrt.f32 %v351_v44  ;;  %v349_v47 = vmul.f32 0.03125, %v345_v46 }
 0x17b   : > { %963 = vrsqrt.f32 %v352_v45 }
 0x17c   : > { %v353_v48 = vadd.f32 1e-05, %v349_v47 }
 0x17e   : > { %965 = vrsqrt.f32 %v353_v48 }
 0x183   : > { %v960_v49 = vpop.eup %959 }
 0x184   : > { %v358_v51 = vmul.f32 %v960_v49, %v1334_v12 }
 0x186   : > { %v368_v52 = vmul.f32 %v831_v50, %v358_v51 }
 0x187   : > { %v962_v53 = vpop.eup %961 }
 0x188   : > { %v964_v55 = vpop.eup %963  ;;  %v359_v56 = vmul.f32 %v962_v53, %v1342_v20  ;;  %v1363_v58 = vadd.f32 %v832_v54, %v368_v52 }
 0x189   : > { %v360_v57 = vmul.f32 %v964_v55, %v1336_v13  ;;  %v1141_v55 = vmov 0  }
 0x18a   : > { %v369_v59 = vmul.f32 %v831_v50, %v359_v56  ;;  %v382_v2 = vsel %vm308_vm0, %v1363_v58, 0.0  ;;  %958 = vset.pattern.permute.xlu1 %v1141_v55  ;;  %957 = vset.pattern.permute.xlu0 %v1141_v55 }
 0x18b   : > { %v966_v60 = vpop.eup %965  ;;  %v370_v61 = vmul.f32 %v831_v50, %v360_v57 }
 0x18c   : > { %v1365_v62 = vadd.f32 %v832_v54, %v369_v59  ;;  %v361_v63 = vmul.f32 %v966_v60, %v1344_v21 }
 0x18d   : > { %v1368_v0 = vadd.f32 %v832_v54, %v370_v61 }
 0x18e   : > { %v371_v1 = vmul.f32 %v831_v50, %v361_v63  ;;  %v383_v3 = vsel %vm308_vm0, %v1365_v62, 0.0 }
 0x18f   : > { %v384_v4 = vadd.f32 %v383_v3, %v382_v2  ;;  %v391_v7 = vsel %vm308_vm0, %v1368_v0, 0.0 }
 0x190   : > { %v1374_v5 = vadd.f32 %v832_v54, %v371_v1 }
 0x191   : > { %v385_v6 = vrot.slane %v384_v4, 4 }
 0x192   : > { %v392_v8 = vsel %vm308_vm0, %v1374_v5, 0.0 }
 0x193   : > { %v386_v9 = vadd.f32 %v385_v6, %v384_v4  ;;  %v393_v10 = vadd.f32 %v392_v8, %v391_v7 }
 0x195   : > { %v387_v11 = vrot.slane %v386_v9, 2  ;;  %v394_v12 = vrot.slane %v393_v10, 4 }
 0x197   : > { %v388_v13 = vadd.f32 %v387_v11, %v386_v9  ;;  %v395_v14 = vadd.f32 %v394_v12, %v393_v10 }
 0x199   : > { %v389_v15 = vrot.slane %v388_v13, 1  ;;  %v396_v16 = vrot.slane %v395_v14, 2 }
 0x19b   : > { %v397_v17 = vadd.f32 %v396_v16, %v395_v14  ;;  %v390_v18 = vadd.f32 %v389_v15, %v388_v13 }
 0x19d   : > { %v398_v19 = vrot.slane %v397_v17, 1  ;;  %v401_v21 = vmul.f32 0.0625, %v390_v18 }
 0x19f   : > { %v399_v20 = vadd.f32 %v398_v19, %v397_v17 }
 0x1a1   : > { %v402_v22 = vmul.f32 0.0625, %v399_v20  ;;  %v839_v20 = vld [vmem:[%s1461_s5] ss:$0 sm:$0xff] }
 0x1a3   : > { %v410_v23 = vsel %vm409_vm2, %v402_v22, %v401_v21 }
 0x1a4   : > { %869 = vmatmul.mubr.msk.f32.vlgmr.msra.gmra.mxu0 %vm308_vm0, %v410_v23  ;;  %880 = vmatmul.mubr.msk.f32.vlgmr.msra.gmra.mxu1 %vm308_vm0, %v410_v23 }
 0x264   : > { %v479_v30 = vpop.f32.mrf.mxu0  ;;  %v553_v31 = vpop.f32.mrf.mxu1 }
 0x265   : > { %v564_v32 = vrot.slane %v479_v30, %v563_v29  ;;  %v641_v33 = vrot.slane %v553_v31, %v563_v29 }
 0x266   : > { %v870_v35 = vpop.f32.mrf.mxu0  ;;  %v881_v36 = vpop.f32.mrf.mxu1 }
 0x267   : > { %v565_v37 = vcombine.high %v564_v32, %v564_v32  ;;  %v572_v38 = vrot.slane %v564_v32, %v563_v29  ;;  %v642_v39 = vcombine.high %v641_v33, %v641_v33  ;;  %v649_v40 = vrot.slane %v641_v33, %v563_v29 }
 0x269   : > { %v579_v41 = vrot.slane %v565_v37, %v563_v29  ;;  %v583_v42 = vrot.slane %v572_v38, %v582_v34  ;;  %v680_v43 = vrot.slane %v649_v40, %v582_v34  ;;  %v656_v44 = vrot.slane %v642_v39, %v563_v29 }
 0x26b   : > { %v586_v45 = vmul.f32 %v583_v42, %v1365_v62  ;;  %v585_v46 = vmul.f32 %v583_v42, %v1363_v58  ;;  %v596_v47 = vrot.slane %v579_v41, %v582_v34  ;;  %v1384_v48 = vrot.slane %v656_v44, %v582_v34 }
 0x26d   : > { %v590_v49 = vsel %vm308_vm0, %v586_v45, 0.0  ;;  %v587_v50 = vsel %vm308_vm0, %v585_v46, 0.0  ;;  %v599_v51 = vmul.f32 %v596_v47, %v1374_v5  ;;  %v598_v52 = vmul.f32 %v596_v47, %v1368_v0 }
 0x26e   : > { %591 = vadd.xlane.f32.xlu1 %v590_v49  ;;  %588 = vadd.xlane.f32.xlu0 %v587_v50 }
 0x26f   : > { %v603_v53 = vsel %vm308_vm0, %v599_v51, 0.0  ;;  %v600_v54 = vsel %vm308_vm0, %v598_v52, 0.0 }
 0x272   : > { %604 = vadd.xlane.f32.xlu1 %v603_v53  ;;  %601 = vadd.xlane.f32.xlu0 %v600_v54 }
 0x2f7   : > { %v592_v56 = vpop.xlane.xlu1 %591  ;;  %v589_v57 = vpop.xlane.xlu0 %588 }
 0x2f8   : > { %v836_v59 = vmul.f32 -0.17677669, %v592_v56  ;;  %v835_v60 = vmul.f32 -0.17677669, %v589_v57 }
 0x2fa   : > { %v616_v61 = vmul.f32 1.442695, %v836_v59  ;;  %v614_v63 = vmul.f32 1.442695, %v835_v60 }
 0x2fb   : > { %v605_v1 = vpop.xlane.xlu1 %604  ;;  %v602_v2 = vpop.xlane.xlu0 %601 }
 0x2fc   : > { %967 = vpow2.f32 %v616_v61  ;;  %v838_v3 = vmul.f32 -0.17677669, %v605_v1  ;;  %v837_v4 = vmul.f32 -0.17677669, %v602_v2 }
 0x2fd   : > { %969 = vpow2.f32 %v614_v63 }
 0x2fe   : > { %v620_v6 = vmul.f32 1.442695, %v838_v3  ;;  %v618_v7 = vmul.f32 1.442695, %v837_v4 }
 0x300   : > { %971 = vpow2.f32 %v620_v6 }
 0x301   : > { %973 = vpow2.f32 %v618_v7 }
 0x309   : > { %v968_v8 = vpop.eup %967 }
 0x30a   : > { %v970_v9 = vpop.eup %969  ;;  %v623_v10 = vadd.f32 1.0, %v968_v8 }
 0x30b   : > { %v622_v11 = vadd.f32 1.0, %v970_v9 }
 0x30c   : > { %975 = vrcp.f32 %v623_v10 }
 0x30d   : > { %v972_v12 = vpop.eup %971  ;;  %977 = vrcp.f32 %v622_v11 }
 0x30e   : > { %v974_v13 = vpop.eup %973  ;;  %v625_v15 = vadd.f32 1.0, %v972_v12 }
 0x30f   : > { %v624_v14 = vadd.f32 1.0, %v974_v13 }
 0x311   : > { %979 = vrcp.f32 %v624_v14 }
 0x312   : > { %981 = vrcp.f32 %v625_v15 }
 0x319   : > { %v976_v16 = vpop.eup %975 }
 0x31a   : > { %v978_v17 = vpop.eup %977  ;;  %664 = vperm.xlu1 %958, %v976_v16  }
 0x31b   : > { %659 = vperm.xlu0 %957, %v978_v17  }
 0x31e   : > { %v980_v18 = vpop.eup %979 }
 0x31f   : > { %669 = vperm.xlu1 %958, %v980_v18   ;;  %v982_v19 = vpop.eup %981 }
 0x323   : > { %674 = vperm.xlu1 %958, %v982_v19  }
 0x395   : > { %v665_v21 = vpop.permute.xlu1 %664 }
 0x396   : > { %v688_v22 = vmul.f32 %v680_v43, %v665_v21  ;;  %v660_v23 = vpop.permute.xlu0 %659 }
 0x397   : > { %v687_v24 = vmul.f32 %v680_v43, %v660_v23 }
 0x398   : > { %v699_v25 = vadd.f32 %v839_v20, %v688_v22 }
 0x399   : > { %v698_v26 = vadd.f32 %v839_v20, %v687_v24 }
 0x39a   : > { %v703_v27 = vadd.f32 %v699_v25, %v1365_v62  ;;  %v670_v28 = vpop.permute.xlu1 %669 }
 0x39b   : > { %v702_v29 = vadd.f32 %v698_v26, %v1363_v58  ;;  %v689_v30 = vmul.f32 %v1384_v48, %v670_v28 }
 0x39c   : > { %707 = vst.msk [vmem:[%s299_s16 + $0x8] sm:$0xff] %vm308_vm0, %v703_v27 }
 0x39d   : > { %706 = vst.msk [vmem:[%s299_s16] sm:$0xff] %vm308_vm0, %v702_v29  ;;  %v700_v31 = vadd.f32 %v839_v20, %v689_v30 }
 0x39e   : > { %v675_v32 = vpop.permute.xlu1 %674 }
 0x39f   : > { %v704_v33 = vadd.f32 %v700_v31, %v1368_v0  ;;  %v690_v34 = vmul.f32 %v1384_v48, %v675_v32 }
 0x3a1   : > { %708 = vst.msk [vmem:[%s299_s16 + $0x10] sm:$0xff] %vm308_vm0, %v704_v33  ;;  %v701_v58 = vadd.f32 %v839_v20, %v690_v34 }
 0x3a3   : > { %v705_v62 = vadd.f32 %v701_v58, %v1374_v5 }
 0x3a5   : > { %709 = vst.msk [vmem:[%s299_s16 + $0x18] sm:$0xff] %vm308_vm0, %v705_v62 }
 0x3a6   : > { %1076 = shalt.err (!%p1073_p3)
}
 0x3a7   : > { %s1077_s15 = scalar_lea.hbm %s1409_s13, 512  ;;  %s1081_s14 = scalar_lea.hbm %s1462_s6, 1024 }
 0x3a8   : > { %p1078_p11 = scmp.ne.s32.totalorder %s1409_s13, %s1077_s15  ;;  %p1082_p4 = scmp.lt.s32.totalorder %s1409_s13, %s1462_s6 }
 0x3a9   : > { %p1083_p6 = scmp.lt.s32.totalorder %s1081_s14, %s1077_s15 }
 0x3aa   : > { %p1079_p9 = pnand %p1078_p11, %p1481_p2 }
 0x3ab   : > { %p1084_p8 = por %p1083_p6, %p1082_p4 }
 0x3ac   : > { %p1080_p1 = pneg %p1079_p9 }
 0x3ae   : > { %p1085_p5 = pnand %p1084_p8, %p1080_p1 }
 0x3b0   : > { %1088 = shalt.err (!%p1085_p5)
}
 0x3b1   : > { %s1143_s26 = smov 128   ;;  %s1144_s11 = smov 8  }
 0x3b2   : > { %892 = dma.vmem_to_hbm [thread:$0]  (%p1481_p2), %s1411_s10, 512, %s1409_s13, %s711_s9, %s1143_s26, %s1143_s26, %s1144_s11  }
 0x3b3 PF: > { %s740_s25 = sand.u32 1, %s1119_s21   ;;  %p1482_p7 = scmp.ne.s32.totalorder %s1470_s28, 0 }
 0x3b4   : > { %p1483_p12 = scmp.ge.s32.totalorder %s1131_s24, 2  ;;  %s741_s18 = scalar_lea.sflag [#allocation4], %s740_s25 }
 0x3b6   : > { %p906_p13 = pnand %p1483_p12, %p1482_p7 }
 0x3b8   : > { %p907_p0 = pneg %p906_p13 }
 0x3ba   : > { %1114 = dma.done.wait (%p907_p0), %s741_s18, 512  }
 0x3bb   : > { %1116 = vsyncadd (%p907_p0), %s741_s18, 4294966784  ;;  %p20_p10 = scmp.ge.s32.totalorder %s1258_s19, 4   ;;  %s1484_s21 = smov %s1123_s22 }
 0x3bc   : > { %s1485_s22 = smov %s1127_s23  ;;  %s1486_s23 = smov %s1274_s7 }
 0x3bd   : > { %s1487_s24 = smov %s1258_s19  ;;  %22 = sbr.rel (!%p20_p10) target bundleno = 6 (0x6), region = 97 }
 0x3c2   :  { %746 = vsyncpa [#allocation3], 1 }
 0x3c3   :  { %748 = vsyncpa [#allocation3 + $0x1], 1 }
 0x3c4   :  { %749 = vsyncpa [#allocation6], 1 }
 0x3c5   :  { %750 = vsyncpa [#allocation4], 1 }
 0x3c6   :  { %752 = vsyncpa [#allocation4 + $0x1], 1 }

</bundles_post_ra>
